<compile_context>
chip_gen: v6e
topology: v6e:2x2x1
jax: 0.10.0
libtpu: 0.0.40
codegen_flags: <defaults>
</compile_context>

<pallas_src>
import jax
import jax.numpy as jnp
from jax.experimental import pallas as pl
from jax.experimental.pallas import tpu as pltpu


def _round_up(x, m):
    return ((x + m - 1) // m) * m


def _make_kernel(two_h_pad, out_pad, out_w):
    def kernel(state_ref, w1_ref, w2_ref, bias_ref, out_ref):
        x = state_ref[...]                                    # [Bb, num_inputs]
        b1 = bias_ref[:, :two_h_pad]                          # [1, two_h_pad]
        b2 = bias_ref[:, two_h_pad:two_h_pad + out_pad]       # [1, out_pad]

        # ---- fused first layer (critic || actor): one MXU push, lane-dense
        h = jnp.dot(x, w1_ref[...], preferred_element_type=jnp.float32) + b1
        h = jnp.maximum(h, 0.0)                               # ReLU on both heads

        # ---- fused second layer (block-diagonal W2) -> packed [Bb, out_pad]
        z = jnp.dot(h, w2_ref[...], preferred_element_type=jnp.float32) + b2

        # numerically stable softmax over the action columns only (1..A)
        col = jax.lax.broadcasted_iota(jnp.int32, z.shape, 1)
        amask = (col >= 1) & (col < out_w)
        masked = jnp.where(amask, z, jnp.float32(-1e30))
        m = jnp.max(masked, axis=1, keepdims=True)
        e = jnp.exp(masked - m)                               # padded lanes -> 0
        denom = jnp.sum(e, axis=1, keepdims=True)
        probs = e / denom                                     # exact reciprocal

        # col 0 keeps the raw value; action cols get probs; pad cols get 0
        out_ref[...] = jnp.where(col == 0, z, probs)

    return kernel


def pack_params(p):
    """Pack per-layer params into the fused kernel operands (done once on host)."""
    num_inputs, hidden = p["wc1"].shape
    num_actions = p["wa3"].shape[1]
    two_h = 2 * hidden
    two_h_pad = _round_up(two_h, 128)       # lane-dense hidden width
    out_w = 1 + num_actions
    out_pad = _round_up(out_w, 128)         # lane-dense packed output width

    w1 = jnp.zeros((num_inputs, two_h_pad), jnp.float32)      # [in, 2H padded]
    w1 = w1.at[:, :hidden].set(p["wc1"])
    w1 = w1.at[:, hidden:two_h].set(p["wa1"])

    w2 = jnp.zeros((two_h_pad, out_pad), jnp.float32)         # block-diagonal
    w2 = w2.at[:hidden, 0:1].set(p["wc3"])                    # value column
    w2 = w2.at[hidden:two_h, 1:out_w].set(p["wa3"])           # logit columns

    bias = jnp.zeros((1, two_h_pad + out_pad), jnp.float32)
    bias = bias.at[:, 0:hidden].set(p["bc1"])
    bias = bias.at[:, hidden:two_h].set(p["ba1"])
    bias = bias.at[:, two_h_pad:two_h_pad + 1].set(p["bc3"])
    bias = bias.at[:, two_h_pad + 1:two_h_pad + out_w].set(p["ba3"])

    return dict(w1=w1, w2=w2, bias=bias, hidden=hidden,
                num_actions=num_actions, two_h_pad=two_h_pad,
                out_pad=out_pad, out_w=out_w)


def actor_critic_forward(state, packed):
    """state: [B, num_inputs] (or [num_inputs], mimicking torch's unsqueeze(0)).
    Returns (value [B, 1], policy_dist [B, num_actions])."""
    state = jnp.asarray(state, jnp.float32)
    if state.ndim == 1:                        # matches `state.unsqueeze(0)`
        state = state[None, :]
    B, num_inputs = state.shape

    two_h_pad = packed["two_h_pad"]
    out_pad = packed["out_pad"]
    out_w = packed["out_w"]

    # Block sizing (dispatch-overhead aware):
    #   * small/medium batches -> single block, grid=(1,): no serial grid
    #     overhead on v5e/v6e's single TensorCore.
    #   * large batches -> chunks of 256 rows over a leading grid axis; weights
    #     keep constant index_maps so they're DMA'd once and stay VMEM-resident
    #     across grid steps; 256 rows keeps softmax temporaries within the
    #     64-vreg file and fills the MXU's 256-row side on v6e/v7x.
    b_padded = _round_up(max(B, 8), 8)
    if b_padded > 256:
        b_blk = 256
        b_padded = _round_up(b_padded, b_blk)
    else:
        b_blk = b_padded
    num_blocks = b_padded // b_blk

    if b_padded != B:
        state = jnp.pad(state, ((0, b_padded - B), (0, 0)))

    # TODO(synk): on v7x, genuinely sharding large batches across the two
    # TensorCores would use pltpu.CORE_PARALLEL / pl.core_map; kept single-core
    # here since the kernel is dispatch-bound at these sizes.
    out = pl.pallas_call(
        _make_kernel(two_h_pad, out_pad, out_w),
        out_shape=jax.ShapeDtypeStruct((b_padded, out_pad), jnp.float32),
        grid=(num_blocks,),
        in_specs=[
            pl.BlockSpec((b_blk, num_inputs), lambda i: (i, 0)),            # states
            pl.BlockSpec((num_inputs, two_h_pad), lambda i: (0, 0)),        # W1 packed
            pl.BlockSpec((two_h_pad, out_pad), lambda i: (0, 0)),           # W2 packed
            pl.BlockSpec((1, two_h_pad + out_pad), lambda i: (0, 0)),       # bias row
        ],
        out_specs=pl.BlockSpec((b_blk, out_pad), lambda i: (i, 0)),
        compiler_params=pltpu.CompilerParams(
            dimension_semantics=("arbitrary",)),
    )(state, packed["w1"], packed["w2"], packed["bias"])

    out = out[:B]
    value = out[:, :1]                 # [B, 1]
    policy = out[:, 1:out_w]           # [B, num_actions]
    return value, policy


def init_params(key, num_inputs, num_actions, hidden_size):
    """nn.Linear-style U(-1/sqrt(fan_in), 1/sqrt(fan_in)) init.
    Weights stored pre-transposed as [in_features, out_features]."""
    ks = jax.random.split(key, 8)

    def lin(kw, kb, fan_in, fan_out):
        bound = 1.0 / jnp.sqrt(jnp.float32(fan_in))
        w = jax.random.uniform(kw, (fan_in, fan_out), jnp.float32, -bound, bound)
        b = jax.random.uniform(kb, (1, fan_out), jnp.float32, -bound, bound)
        return w, b

    wc1, bc1 = lin(ks[0], ks[1], num_inputs, hidden_size)
    wc3, bc3 = lin(ks[2], ks[3], hidden_size, 1)
    wa1, ba1 = lin(ks[4], ks[5], num_inputs, hidden_size)
    wa3, ba3 = lin(ks[6], ks[7], hidden_size, num_actions)
    return dict(wc1=wc1, bc1=bc1, wc3=wc3, bc3=bc3,
                wa1=wa1, ba1=ba1, wa3=wa3, ba3=ba3)


def reference_forward(state, p):
    """Pure-JAX reference (unfused) for correctness checking."""
    hc = jnp.maximum(state @ p["wc1"] + p["bc1"], 0.0)
    value = hc @ p["wc3"] + p["bc3"]
    ha = jnp.maximum(state @ p["wa1"] + p["ba1"], 0.0)
    logits = ha @ p["wa3"] + p["ba3"]
    return value, jax.nn.softmax(logits, axis=1)


if __name__ == "__main__":
    # Small shapes consistent with the module; batch of environment states.
    num_inputs, num_actions, hidden_size = 16, 8, 32
    B = 128

    key = jax.random.PRNGKey(0)
    pkey, skey = jax.random.split(key)
    params = init_params(pkey, num_inputs, num_actions, hidden_size)
    packed = pack_params(params)
    states = jax.random.normal(skey, (B, num_inputs), jnp.float32)

    # batched forward (single block, grid=(1,))
    value, policy = actor_critic_forward(states, packed)
    value, policy = jax.block_until_ready((value, policy))

    v_ref, p_ref = reference_forward(states, params)
    assert value.shape == (B, 1) and policy.shape == (B, num_actions)
    assert jnp.allclose(value, v_ref, atol=1e-5, rtol=1e-5)
    assert jnp.allclose(policy, p_ref, atol=1e-5, rtol=1e-5)
    assert jnp.allclose(jnp.sum(policy, axis=1), 1.0, atol=1e-5)

    # single-state path (mimics the module's forward(state) with unsqueeze(0))
    v1, p1 = actor_critic_forward(states[0], packed)
    v1, p1 = jax.block_until_ready((v1, p1))
    assert v1.shape == (1, 1) and p1.shape == (1, num_actions)
    assert jnp.allclose(v1, v_ref[:1], atol=1e-5, rtol=1e-5)
    assert jnp.allclose(p1, p_ref[:1], atol=1e-5, rtol=1e-5)

    # large-batch path: chunked leading grid axis (256-row blocks), weights
    # DMA'd once and reused across all grid steps.
    Bbig = 600
    big_states = jax.random.normal(jax.random.PRNGKey(1), (Bbig, num_inputs),
                                   jnp.float32)
    vb, pb = actor_critic_forward(big_states, packed)
    vb, pb = jax.block_until_ready((vb, pb))
    vb_ref, pb_ref = reference_forward(big_states, params)
    assert vb.shape == (Bbig, 1) and pb.shape == (Bbig, num_actions)
    assert jnp.allclose(vb, vb_ref, atol=1e-5, rtol=1e-5)
    assert jnp.allclose(pb, pb_ref, atol=1e-5, rtol=1e-5)

    # TODO(synk): save()/optimizer setup are host-side checkpointing, not kernel work.
    print("KERNEL_OK")
</pallas_src>

<mosaic_0001>
module attributes {stable_mosaic.version = 11 : i64} {
  func.func @kernel(%arg0: i32, %arg1: memref<128x16xf32, #tpu.memory_space<vmem>>, %arg2: memref<16x128xf32, #tpu.memory_space<vmem>>, %arg3: memref<128x128xf32, #tpu.memory_space<vmem>>, %arg4: memref<1x256xf32, #tpu.memory_space<vmem>>, %arg5: memref<128x128xf32, #tpu.memory_space<vmem>>) attributes {dimension_semantics = [#tpu.dimension_semantics<arbitrary>], iteration_bounds = array<i64: 1>, scalar_prefetch = 0 : i64, scratch_operands = 0 : i64, tpu.core_type = #tpu.core_type<tc>, window_params = [{transform_indices = @transform_0, window_bounds = array<i64: 128, 16>}, {pipeline_mode = #tpu.pipeline_mode<synchronous>, transform_indices = @transform_1, window_bounds = array<i64: 16, 128>}, {pipeline_mode = #tpu.pipeline_mode<synchronous>, transform_indices = @transform_2, window_bounds = array<i64: 128, 128>}, {pipeline_mode = #tpu.pipeline_mode<synchronous>, transform_indices = @transform_3, window_bounds = array<i64: 1, 256>}, {transform_indices = @transform_4, window_bounds = array<i64: 128, 128>}]} {
    %c0 = arith.constant 0 : index
    %c0_0 = arith.constant 0 : index
    %0 = vector.load %arg1[%c0, %c0_0] : memref<128x16xf32, #tpu.memory_space<vmem>>, vector<128x16xf32>
    %c0_1 = arith.constant 0 : index
    %c0_2 = arith.constant 0 : index
    %1 = vector.load %arg4[%c0_1, %c0_2] : memref<1x256xf32, #tpu.memory_space<vmem>>, vector<1x128xf32>
    %c0_3 = arith.constant 0 : index
    %c128 = arith.constant 128 : index
    %2 = vector.load %arg4[%c0_3, %c128] : memref<1x256xf32, #tpu.memory_space<vmem>>, vector<1x128xf32>
    %c0_4 = arith.constant 0 : index
    %c0_5 = arith.constant 0 : index
    %3 = vector.load %arg2[%c0_4, %c0_5] : memref<16x128xf32, #tpu.memory_space<vmem>>, vector<16x128xf32>
    %cst = arith.constant dense<0.000000e+00> : vector<128x128xf32>
    %4 = tpu.matmul %0, %3, %cst {dimension_numbers = #tpu.dot_dimension_numbers<[1], [0], [0], [1], [0, 0, 1, 1], [], []>} : vector<128x16xf32>, vector<16x128xf32>, vector<128x128xf32> -> vector<128x128xf32>
    %5 = vector.broadcast %1 : vector<1x128xf32> to vector<128x128xf32>
    %6 = arith.addf %4, %5 : vector<128x128xf32>
    %cst_6 = arith.constant 0.000000e+00 : f32
    %7 = vector.broadcast %cst_6 : f32 to vector<128x128xf32>
    %8 = arith.maximumf %6, %7 : vector<128x128xf32>
    %c0_7 = arith.constant 0 : index
    %c0_8 = arith.constant 0 : index
    %9 = vector.load %arg3[%c0_7, %c0_8] : memref<128x128xf32, #tpu.memory_space<vmem>>, vector<128x128xf32>
    %cst_9 = arith.constant dense<0.000000e+00> : vector<128x128xf32>
    %10 = tpu.matmul %8, %9, %cst_9 {dimension_numbers = #tpu.dot_dimension_numbers<[1], [0], [0], [1], [0, 0, 1, 1], [], []>} : vector<128x128xf32>, vector<128x128xf32>, vector<128x128xf32> -> vector<128x128xf32>
    %11 = vector.broadcast %2 : vector<1x128xf32> to vector<128x128xf32>
    %12 = arith.addf %10, %11 : vector<128x128xf32>
    %13 = tpu.iota {dimensions = array<i32: 1>} : vector<128x128xi32>
    %c1_i32 = arith.constant 1 : i32
    %14 = vector.broadcast %c1_i32 : i32 to vector<128x128xi32>
    %15 = arith.cmpi sge, %13, %14 : vector<128x128xi32>
    %c9_i32 = arith.constant 9 : i32
    %16 = vector.broadcast %c9_i32 : i32 to vector<128x128xi32>
    %17 = arith.cmpi slt, %13, %16 : vector<128x128xi32>
    %18 = arith.andi %15, %17 : vector<128x128xi1>
    %cst_10 = arith.constant -1.000000e+30 : f32
    %19 = vector.broadcast %cst_10 : f32 to vector<128x128xf32>
    %20 = arith.select %18, %12, %19 : vector<128x128xi1>, vector<128x128xf32>
    %cst_11 = arith.constant dense<0xFF800000> : vector<128xf32>
    %21 = vector.multi_reduction <maximumf>, %20, %cst_11 [1] : vector<128x128xf32> to vector<128xf32>
    %22 = vector.shape_cast %21 : vector<128xf32> to vector<128x1xf32>
    %23 = vector.broadcast %22 : vector<128x1xf32> to vector<128x128xf32>
    %24 = arith.subf %20, %23 : vector<128x128xf32>
    %25 = math.exp %24 : vector<128x128xf32>
    %cst_12 = arith.constant dense<0.000000e+00> : vector<128xf32>
    %26 = vector.multi_reduction <add>, %25, %cst_12 [1] : vector<128x128xf32> to vector<128xf32>
    %27 = vector.shape_cast %26 : vector<128xf32> to vector<128x1xf32>
    %28 = vector.broadcast %27 : vector<128x1xf32> to vector<128x128xf32>
    %29 = arith.divf %25, %28 : vector<128x128xf32>
    %c0_i32 = arith.constant 0 : i32
    %30 = vector.broadcast %c0_i32 : i32 to vector<128x128xi32>
    %31 = arith.cmpi eq, %13, %30 : vector<128x128xi32>
    %32 = arith.select %31, %12, %29 : vector<128x128xi1>, vector<128x128xf32>
    %c0_13 = arith.constant 0 : index
    %c0_14 = arith.constant 0 : index
    %33 = vector.load %arg5[%c0_13, %c0_14] : memref<128x128xf32, #tpu.memory_space<vmem>>, vector<128x128xf32>
    tpu.vector_store %arg5[%c0_13, %c0_14], %32 {strides = array<i32>} : memref<128x128xf32, #tpu.memory_space<vmem>>, vector<128x128xf32>,
    return
  }
  func.func @transform_0(%arg0: i32) -> (i32, i32) {
    %c0_i32 = arith.constant 0 : i32
    %c0_i32_0 = arith.constant 0 : i32
    return %arg0, %c0_i32 : i32, i32
  }
  func.func @transform_1(%arg0: i32) -> (i32, i32) {
    %c0_i32 = arith.constant 0 : i32
    %c0_i32_0 = arith.constant 0 : i32
    %c0_i32_1 = arith.constant 0 : i32
    return %c0_i32, %c0_i32_0 : i32, i32
  }
  func.func @transform_2(%arg0: i32) -> (i32, i32) {
    %c0_i32 = arith.constant 0 : i32
    %c0_i32_0 = arith.constant 0 : i32
    %c0_i32_1 = arith.constant 0 : i32
    return %c0_i32, %c0_i32_0 : i32, i32
  }
  func.func @transform_3(%arg0: i32) -> (i32, i32) {
    %c0_i32 = arith.constant 0 : i32
    %c0_i32_0 = arith.constant 0 : i32
    %c0_i32_1 = arith.constant 0 : i32
    return %c0_i32, %c0_i32_0 : i32, i32
  }
  func.func @transform_4(%arg0: i32) -> (i32, i32) {
    %c0_i32 = arith.constant 0 : i32
    %c0_i32_0 = arith.constant 0 : i32
    return %arg0, %c0_i32 : i32, i32
  }
}

</mosaic_0001>

<bundles_post_ra>
// kernel: tpu_custom_call.1
= control target key start
LH: loop header
LB: loop body
LE: loop exit
PB: predicated region body
PF: predicated region fallthrough
CT: control target
= control target key end

     0   :  { %vm44_vm0 = vcmask 130048   ;;  %s1304_s0 = inlined_call_operand.vmem [shape: f32[128,16], index: 0, kind: input, shape index: {}]   ;;  %s1305_s1 = inlined_call_operand.vmem [shape: f32[16,128], index: 1, kind: input, shape index: {}]   ;;  %s1306_s2 = inlined_call_operand.vmem [shape: f32[128,128], index: 2, kind: input, shape index: {}]   ;;  %s1307_s3 = inlined_call_operand.vmem [shape: f32[1,256], index: 3, kind: input, shape index: {}]   ;;  %s1308_s4 = inlined_call_operand.hbm [shape: f32[128,128], index: 4, kind: output, shape index: {}]  }
   0x1   :  { %v37_v0 = vld [vmem:[%s1305_s1 + $0x8] sm:$0xff]  ;;  %v36_v1 = vld [vmem:[%s1305_s1] sm:$0xff]  ;;  %v20_v4 = vld [vmem:[%s1304_s0 + $0x10] sm:$0xff] }
   0x2   :  { %v18_v2 = vld [vmem:[%s1304_s0] sm:$0xff]  ;;  %703 = vmatprep.subr.mxu0 %v37_v0  ;;  %v19_v3 = vld [vmem:[%s1304_s0 + $0x8] sm:$0xff]  ;;  %v21_v5 = vld [vmem:[%s1304_s0 + $0x18] sm:$0xff] }
   0x3   :  { %707 = vmatprep.mubr.msk.f32.mxu0 %vm44_vm0, %v18_v2  ;;  %704 = vmatpush3.msra.mxu0 %v37_v0  ;;  %v269_v6 = vld [vmem:[%s1306_s2 + $0x78] sm:$0xff]  ;;  %v268_v7 = vld [vmem:[%s1306_s2 + $0x70] sm:$0xff]  ;;  %v22_v8 = vld [vmem:[%s1304_s0 + $0x20] sm:$0xff] }
   0x4   :  { %705 = vmatprep.subr.mxu0 %v36_v1  ;;  %787 = vmatprep.subr.mxu1 %v269_v6  ;;  %v267_v9 = vld [vmem:[%s1306_s2 + $0x68] sm:$0xff]  ;;  %v266_v11 = vld [vmem:[%s1306_s2 + $0x60] sm:$0xff] }
   0x5   :  { %706 = vmatpush3.msra.mxu0 %v36_v1  ;;  %803 = vmatpush3.msra.mxu1 %v269_v6  ;;  %v23_v10 = vld [vmem:[%s1304_s0 + $0x28] sm:$0xff] }
   0x6   :  { %708 = vmatmul.mubr.msk.f32.vlgmr.msra.gmra.mxu0 %vm44_vm0, %v19_v3  ;;  %731 = vmatprep.subr.mxu0 %v269_v6 }
   0x7   :  { %710 = vmatprep.mubr.msk.f32.mxu0 %vm44_vm0, %v20_v4  ;;  %732 = vmatpush3.msra.mxu0 %v269_v6 }
   0x8   :  { %733 = vmatprep.subr.mxu0 %v268_v7 }
   0x9   :  { %734 = vmatpush3.msra.mxu0 %v268_v7 }
   0xa   :  { %711 = vmatmul.mubr.msk.f32.gmra.mxu0 %vm44_vm0, %v21_v5 }
   0xb   :  { %713 = vmatprep.mubr.msk.f32.mxu0 %vm44_vm0, %v22_v8 }
   0xc   :  { %9 = vsyncpa [#allocation3], 0  ;;  %v24_v12 = vld [vmem:[%s1304_s0 + $0x30] sm:$0xff]  ;;  %735 = vmatprep.subr.mxu0 %v267_v9  ;;  %788 = vmatprep.subr.mxu1 %v268_v7  ;;  %v265_v13 = vld [vmem:[%s1306_s2 + $0x58] sm:$0xff] }
   0xd   :  { %736 = vmatpush3.msra.mxu0 %v267_v9  ;;  %804 = vmatpush3.msra.mxu1 %v268_v7  ;;  %v25_v14 = vld [vmem:[%s1304_s0 + $0x38] sm:$0xff]  ;;  %v264_v15 = vld [vmem:[%s1306_s2 + $0x50] sm:$0xff]  ;;  %v26_v16 = vld [vmem:[%s1304_s0 + $0x40] sm:$0xff] }
   0xe   :  { %714 = vmatmul.mubr.msk.f32.gmra.mxu0 %vm44_vm0, %v23_v10  ;;  %737 = vmatprep.subr.mxu0 %v266_v11  ;;  %v263_v17 = vld [vmem:[%s1306_s2 + $0x48] sm:$0xff]  ;;  %v262_v19 = vld [vmem:[%s1306_s2 + $0x40] sm:$0xff]  ;;  %v28_v20 = vld [vmem:[%s1304_s0 + $0x50] sm:$0xff] }
   0xf   :  { %716 = vmatprep.mubr.msk.f32.mxu0 %vm44_vm0, %v24_v12  ;;  %738 = vmatpush3.msra.mxu0 %v266_v11  ;;  %v27_v18 = vld [vmem:[%s1304_s0 + $0x48] sm:$0xff]  ;;  %v261_v21 = vld [vmem:[%s1306_s2 + $0x38] sm:$0xff]  ;;  %v260_v23 = vld [vmem:[%s1306_s2 + $0x30] sm:$0xff] }
  0x10   :  { %739 = vmatprep.subr.mxu0 %v265_v13  ;;  %789 = vmatprep.subr.mxu1 %v267_v9  ;;  %v29_v22 = vld [vmem:[%s1304_s0 + $0x58] sm:$0xff]  ;;  %v30_v24 = vld [vmem:[%s1304_s0 + $0x60] sm:$0xff]  ;;  %v259_v25 = vld [vmem:[%s1306_s2 + $0x28] sm:$0xff] }
  0x11   :  { %740 = vmatpush3.msra.mxu0 %v265_v13  ;;  %805 = vmatpush3.msra.mxu1 %v267_v9  ;;  %v31_v26 = vld [vmem:[%s1304_s0 + $0x68] sm:$0xff]  ;;  %v258_v27 = vld [vmem:[%s1306_s2 + $0x20] sm:$0xff]  ;;  %v32_v28 = vld [vmem:[%s1304_s0 + $0x70] sm:$0xff] }
  0x12   :  { %717 = vmatmul.mubr.msk.f32.gmra.mxu0 %vm44_vm0, %v25_v14  ;;  %741 = vmatprep.subr.mxu0 %v264_v15  ;;  %v257_v29 = vld [vmem:[%s1306_s2 + $0x18] sm:$0xff]  ;;  %v256_v31 = vld [vmem:[%s1306_s2 + $0x10] sm:$0xff]  ;;  %v255_v32 = vld [vmem:[%s1306_s2 + $0x8] sm:$0xff] }
  0x13   :  { %719 = vmatprep.mubr.msk.f32.mxu0 %vm44_vm0, %v26_v16  ;;  %742 = vmatpush3.msra.mxu0 %v264_v15  ;;  %v33_v30 = vld [vmem:[%s1304_s0 + $0x78] sm:$0xff]  ;;  %v254_v33 = vld [vmem:[%s1306_s2] sm:$0xff] }
  0x14   :  { %743 = vmatprep.subr.mxu0 %v263_v17  ;;  %790 = vmatprep.subr.mxu1 %v266_v11  ;;  %v635_v34 = vld [vmem:[%s1307_s3] ss:$0 sm:$0xff] }
  0x15   :  { %744 = vmatpush3.msra.mxu0 %v263_v17  ;;  %806 = vmatpush3.msra.mxu1 %v266_v11 }
  0x16   :  { %720 = vmatmul.mubr.msk.f32.gmra.mxu0 %vm44_vm0, %v27_v18  ;;  %745 = vmatprep.subr.mxu0 %v262_v19 }
  0x17   :  { %722 = vmatprep.mubr.msk.f32.mxu0 %vm44_vm0, %v28_v20  ;;  %746 = vmatpush3.msra.mxu0 %v262_v19 }
  0x18   :  { %747 = vmatprep.subr.mxu0 %v261_v21  ;;  %791 = vmatprep.subr.mxu1 %v265_v13 }
  0x19   :  { %748 = vmatpush3.msra.mxu0 %v261_v21  ;;  %807 = vmatpush3.msra.mxu1 %v265_v13 }
  0x1a   :  { %723 = vmatmul.mubr.msk.f32.gmra.mxu0 %vm44_vm0, %v29_v22  ;;  %749 = vmatprep.subr.mxu0 %v260_v23 }
  0x1b   :  { %725 = vmatprep.mubr.msk.f32.mxu0 %vm44_vm0, %v30_v24  ;;  %750 = vmatpush3.msra.mxu0 %v260_v23 }
  0x1c   :  { %751 = vmatprep.subr.mxu0 %v259_v25  ;;  %792 = vmatprep.subr.mxu1 %v264_v15 }
  0x1d   :  { %752 = vmatpush3.msra.mxu0 %v259_v25  ;;  %808 = vmatpush3.msra.mxu1 %v264_v15 }
  0x1e   :  { %726 = vmatmul.mubr.msk.f32.gmra.mxu0 %vm44_vm0, %v31_v26  ;;  %753 = vmatprep.subr.mxu0 %v258_v27 }
  0x1f   :  { %728 = vmatprep.mubr.msk.f32.mxu0 %vm44_vm0, %v32_v28  ;;  %754 = vmatpush3.msra.mxu0 %v258_v27 }
  0x20   :  { %755 = vmatprep.subr.mxu0 %v257_v29  ;;  %793 = vmatprep.subr.mxu1 %v263_v17 }
  0x21   :  { %756 = vmatpush3.msra.mxu0 %v257_v29  ;;  %809 = vmatpush3.msra.mxu1 %v263_v17 }
  0x22   :  { %729 = vmatmul.mubr.msk.f32.gmra.mxu0 %vm44_vm0, %v33_v30  ;;  %794 = vmatprep.subr.mxu1 %v262_v19 }
  0x23   :  { %810 = vmatpush3.msra.mxu1 %v262_v19  ;;  %757 = vmatprep.subr.mxu0 %v256_v31  ;;  %v421_v19 = vlaneseq }
  0x24   :  { %795 = vmatprep.subr.mxu1 %v261_v21  ;;  %758 = vmatpush3.msra.mxu0 %v256_v31 }
  0x25   :  { %811 = vmatpush3.msra.mxu1 %v261_v21  ;;  %759 = vmatprep.subr.mxu0 %v255_v32  ;;  %v1057_v20 = vand.u32 127, %v421_v19  ;;  %v652_v21 = vld [vmem:[%s1307_s3 + $0x1] ss:$0 sm:$0xff]  ;;  %s908_s3 = smov [#allocation2]  }
  0x26   :  { %796 = vmatprep.subr.mxu1 %v260_v23  ;;  %760 = vmatpush3.msra.mxu0 %v255_v32  ;;  %s624_s30 = sshll.u32 %s908_s3, 4  ;;  %s625_s30 = int_to_ptr.vmem [resolvable:$true] %s624_s30 }
  0x27   :  { %812 = vmatpush3.msra.mxu1 %v260_v23  ;;  %761 = vmatprep.subr.mxu0 %v254_v33  ;;  %vm423_vm1 = vcmp.ge.s32.totalorder %v1057_v20, 1  ;;  %vm424_vm2 = vcmp.lt.s32.totalorder %v1057_v20, 9  ;;  %vm586_vm4 = vcmp.eq.s32.totalorder %v1057_v20, 0  ;;  %s886_s5 = scalar_lea.vmem %s625_s30, 2048  ;;  %p891_p1 = scmp.lt.s32.totalorder %s625_s30, %s625_s30 }
  0x28   :  { %797 = vmatprep.subr.mxu1 %v259_v25  ;;  %762 = vmatpush3.msra.mxu0 %v254_v33  ;;  %vm1064_vm3 = vmand %vm423_vm1, %vm424_vm2  ;;  %p887_p0 = scmp.ne.s32.totalorder %s625_s30, %s886_s5  ;;  %p892_p2 = scmp.lt.s32.totalorder %s886_s5, %s886_s5 }
  0x29   :  { %813 = vmatpush3.msra.mxu1 %v259_v25 }
  0x2a   :  { %798 = vmatprep.subr.mxu1 %v258_v27  ;;  %p893_p3 = por %p892_p2, %p891_p1 }
  0x2b   :  { %814 = vmatpush3.msra.mxu1 %v258_v27 }
  0x2c   :  { %799 = vmatprep.subr.mxu1 %v257_v29  ;;  %p894_p4 = pnand %p893_p3, %p887_p0 }
  0x2d   :  { %815 = vmatpush3.msra.mxu1 %v257_v29 }
  0x2e   :  { %800 = vmatprep.subr.mxu1 %v256_v31 }
  0x2f   :  { %816 = vmatpush3.msra.mxu1 %v256_v31 }
  0x30   :  { %801 = vmatprep.subr.mxu1 %v255_v32 }
  0x31   :  { %817 = vmatpush3.msra.mxu1 %v255_v32 }
  0x32   :  { %802 = vmatprep.subr.mxu1 %v254_v33 }
  0x33   :  { %818 = vmatpush3.msra.mxu1 %v254_v33 }
  0xc6   :  { %v709_v35 = vpop.f32.mrf.mxu0 }
  0xc7   :  { %v165_v36 = vadd.f32 %v709_v35, %v635_v34 }
  0xc8   :  { %v159_v37 = vpop.f32.mrf.mxu0 }
  0xc9   :  { %v160_v38 = vadd.f32 %v635_v34, %v159_v37  ;;  %v239_v41 = vmax.f32 %v165_v36, 0.0 }
  0xca   :  { %v712_v39 = vpop.f32.mrf.mxu0 }
  0xcb   :  { %v238_v40 = vmax.f32 %v160_v38, 0.0  ;;  %v175_v42 = vadd.f32 %v712_v39, %v635_v34 }
  0xcc   :  { %v169_v43 = vpop.f32.mrf.mxu0 }
  0xcd   :  { %v170_v44 = vadd.f32 %v635_v34, %v169_v43  ;;  %763 = vmatprep.mubr.f32.mxu0 %v238_v40  ;;  %v241_v48 = vmax.f32 %v175_v42, 0.0 }
  0xce   :  { %v715_v45 = vpop.f32.mrf.mxu0  ;;  %764 = vmatmul.mubr.f32.vlgmr.msra.gmra.mxu0 %v239_v41 }
  0xcf   :  { %v240_v46 = vmax.f32 %v170_v44, 0.0  ;;  %v185_v47 = vadd.f32 %v715_v45, %v635_v34 }
  0xd0   :  { %v179_v49 = vpop.f32.mrf.mxu0 }
  0xd1   :  { %v180_v50 = vadd.f32 %v635_v34, %v179_v49  ;;  %766 = vmatprep.mubr.f32.mxu0 %v240_v46  ;;  %v243_v51 = vmax.f32 %v185_v47, 0.0 }
  0xd2   :  { %v718_v52 = vpop.f32.mrf.mxu0  ;;  %767 = vmatmul.mubr.f32.gmra.mxu0 %v241_v48 }
  0xd3   :  { %v242_v53 = vmax.f32 %v180_v50, 0.0  ;;  %v195_v54 = vadd.f32 %v718_v52, %v635_v34 }
  0xd4   :  { %v189_v55 = vpop.f32.mrf.mxu0 }
  0xd5   :  { %769 = vmatprep.mubr.f32.mxu0 %v242_v53  ;;  %v190_v56 = vadd.f32 %v635_v34, %v189_v55  ;;  %v245_v57 = vmax.f32 %v195_v54, 0.0 }
  0xd6   :  { %v721_v58 = vpop.f32.mrf.mxu0  ;;  %770 = vmatmul.mubr.f32.gmra.mxu0 %v243_v51 }
  0xd7   :  { %v205_v59 = vadd.f32 %v721_v58, %v635_v34  ;;  %v244_v60 = vmax.f32 %v190_v56, 0.0 }
  0xd8   :  { %v199_v61 = vpop.f32.mrf.mxu0 }
  0xd9   :  { %v200_v62 = vadd.f32 %v635_v34, %v199_v61  ;;  %772 = vmatprep.mubr.f32.mxu1 %v244_v60  ;;  %v247_v63 = vmax.f32 %v205_v59, 0.0 }
  0xda   :  { %v724_v0 = vpop.f32.mrf.mxu0  ;;  %773 = vmatmul.mubr.f32.vlgmr.msra.gmra.mxu1 %v245_v57 }
  0xdb   :  { %v246_v1 = vmax.f32 %v200_v62, 0.0  ;;  %v215_v2 = vadd.f32 %v724_v0, %v635_v34 }
  0xdc   :  { %v209_v3 = vpop.f32.mrf.mxu0 }
  0xdd   :  { %v210_v4 = vadd.f32 %v635_v34, %v209_v3  ;;  %775 = vmatprep.mubr.f32.mxu1 %v246_v1  ;;  %v249_v5 = vmax.f32 %v215_v2, 0.0 }
  0xde   :  { %v727_v6 = vpop.f32.mrf.mxu0  ;;  %776 = vmatmul.mubr.f32.gmra.mxu1 %v247_v63 }
  0xdf   :  { %v248_v7 = vmax.f32 %v210_v4, 0.0  ;;  %v225_v8 = vadd.f32 %v727_v6, %v635_v34 }
  0xe0   :  { %v219_v9 = vpop.f32.mrf.mxu0 }
  0xe1   :  { %v220_v10 = vadd.f32 %v635_v34, %v219_v9  ;;  %778 = vmatprep.mubr.f32.mxu1 %v248_v7  ;;  %v251_v11 = vmax.f32 %v225_v8, 0.0 }
  0xe2   :  { %v730_v12 = vpop.f32.mrf.mxu0  ;;  %779 = vmatmul.mubr.f32.gmra.mxu1 %v249_v5 }
  0xe3   :  { %v250_v13 = vmax.f32 %v220_v10, 0.0  ;;  %v235_v14 = vadd.f32 %v730_v12, %v635_v34 }
  0xe4   :  { %v229_v15 = vpop.f32.mrf.mxu0 }
  0xe5   :  { %v230_v16 = vadd.f32 %v635_v34, %v229_v15  ;;  %781 = vmatprep.mubr.f32.mxu1 %v250_v13  ;;  %v253_v17 = vmax.f32 %v235_v14, 0.0 }
  0xe6   :  { %782 = vmatmul.mubr.f32.gmra.mxu1 %v251_v11 }
  0xe7   :  { %v252_v18 = vmax.f32 %v230_v16, 0.0 }
  0xe9   :  { %784 = vmatprep.mubr.f32.mxu1 %v252_v18 }
  0xea   :  { %785 = vmatmul.mubr.f32.gmra.mxu1 %v253_v17 }
 0x18e   :  { %v765_v22 = vpop.f32.mrf.mxu0 }
 0x18f   :  { %v1068_v24 = vadd.f32 %v765_v22, %v652_v21 }
 0x190   :  { %v342_v25 = vpop.f32.mrf.mxu0 }
 0x191   :  { %v1070_v26 = vadd.f32 %v652_v21, %v342_v25  ;;  %v427_v27 = vsel %vm1064_vm3, %v1068_v24, -1e+30 }
 0x192   :  { %444 = vmax.xlane.f32.xlu0 %v427_v27  ;;  %v768_v28 = vpop.f32.mrf.mxu0 }
 0x193   :  { %v1075_v29 = vadd.f32 %v768_v28, %v652_v21  ;;  %v426_v33 = vsel %vm1064_vm3, %v1070_v26, -1e+30 }
 0x194   :  { %v352_v30 = vpop.f32.mrf.mxu0 }
 0x195   :  { %v1077_v31 = vadd.f32 %v652_v21, %v352_v30  ;;  %v429_v32 = vsel %vm1064_vm3, %v1075_v29, -1e+30 }
 0x196   :  { %448 = vmax.xlane.f32.xlu1 %v429_v32  ;;  %v771_v34 = vpop.f32.mrf.mxu0  ;;  %442 = vmax.xlane.f32.xlu0 %v426_v33 }
 0x197   :  { %v1085_v36 = vadd.f32 %v771_v34, %v652_v21  ;;  %v428_v38 = vsel %vm1064_vm3, %v1077_v31, -1e+30 }
 0x198   :  { %v362_v35 = vpop.f32.mrf.mxu0 }
 0x199   :  { %v1087_v37 = vadd.f32 %v652_v21, %v362_v35  ;;  %v431_v44 = vsel %vm1064_vm3, %v1085_v36, -1e+30 }
 0x19a   :  { %v774_v39 = vpop.f32.mrf.mxu1  ;;  %446 = vmax.xlane.f32.xlu1 %v428_v38 }
 0x19b   :  { %v1095_v40 = vsel %vm1064_vm3, %v1087_v37, -1e+30  ;;  %v1098_v42 = vadd.f32 %v774_v39, %v652_v21 }
 0x19c   :  { %v372_v41 = vpop.f32.mrf.mxu1  ;;  %450 = vmax.xlane.f32.xlu0 %v1095_v40 }
 0x19d   :  { %v1100_v43 = vadd.f32 %v652_v21, %v372_v41  ;;  %v433_v50 = vsel %vm1064_vm3, %v1098_v42, -1e+30 }
 0x19e   :  { %v777_v45 = vpop.f32.mrf.mxu1  ;;  %452 = vmax.xlane.f32.xlu1 %v431_v44 }
 0x19f   :  { %v1108_v46 = vsel %vm1064_vm3, %v1100_v43, -1e+30  ;;  %v1111_v48 = vadd.f32 %v777_v45, %v652_v21 }
 0x1a0   :  { %v382_v47 = vpop.f32.mrf.mxu1  ;;  %454 = vmax.xlane.f32.xlu0 %v1108_v46 }
 0x1a1   :  { %v1113_v49 = vadd.f32 %v652_v21, %v382_v47  ;;  %v1131_v56 = vsel %vm1064_vm3, %v1111_v48, -1e+30 }
 0x1a2   :  { %v780_v51 = vpop.f32.mrf.mxu1  ;;  %456 = vmax.xlane.f32.xlu1 %v433_v50 }
 0x1a3   :  { %v1121_v52 = vsel %vm1064_vm3, %v1113_v49, -1e+30  ;;  %v1124_v54 = vadd.f32 %v780_v51, %v652_v21 }
 0x1a4   :  { %v392_v53 = vpop.f32.mrf.mxu1  ;;  %458 = vmax.xlane.f32.xlu0 %v1121_v52 }
 0x1a5   :  { %v1126_v55 = vadd.f32 %v652_v21, %v392_v53  ;;  %v1147_v62 = vsel %vm1064_vm3, %v1124_v54, -1e+30 }
 0x1a6   :  { %v783_v57 = vpop.f32.mrf.mxu1  ;;  %460 = vmax.xlane.f32.xlu1 %v1131_v56 }
 0x1a7   :  { %v1137_v58 = vsel %vm1064_vm3, %v1126_v55, -1e+30  ;;  %v1140_v60 = vadd.f32 %v783_v57, %v652_v21 }
 0x1a8   :  { %v402_v59 = vpop.f32.mrf.mxu1  ;;  %462 = vmax.xlane.f32.xlu0 %v1137_v58 }
 0x1a9   :  { %v1142_v61 = vadd.f32 %v652_v21, %v402_v59  ;;  %v1163_v4 = vsel %vm1064_vm3, %v1140_v60, -1e+30 }
 0x1aa   :  { %v786_v63 = vpop.f32.mrf.mxu1  ;;  %464 = vmax.xlane.f32.xlu1 %v1147_v62 }
 0x1ab   :  { %v1153_v0 = vsel %vm1064_vm3, %v1142_v61, -1e+30  ;;  %v1156_v2 = vadd.f32 %v786_v63, %v652_v21 }
 0x1ac   :  { %v412_v1 = vpop.f32.mrf.mxu1  ;;  %466 = vmax.xlane.f32.xlu0 %v1153_v0 }
 0x1ad   :  { %v1158_v3 = vadd.f32 %v652_v21, %v412_v1  ;;  %v1175_v6 = vsel %vm1064_vm3, %v1156_v2, -1e+30 }
 0x1ae   :  { %468 = vmax.xlane.f32.xlu1 %v1163_v4 }
 0x1af   :  { %v1169_v5 = vsel %vm1064_vm3, %v1158_v3, -1e+30 }
 0x1b0   :  { %470 = vmax.xlane.f32.xlu0 %v1169_v5 }
 0x1b2   :  { %472 = vmax.xlane.f32.xlu1 %v1175_v6 }
 0x21b   :  { %v445_v7 = vpop.xlane.xlu0 %444 }
 0x21c   :  { %v475_v8 = vsub.f32 %v427_v27, %v445_v7 }
 0x21e   :  { %v492_v9 = vmul.f32 1.442695, %v475_v8 }
 0x21f   :  { %v449_v10 = vpop.xlane.xlu1 %448  ;;  %v443_v11 = vpop.xlane.xlu0 %442 }
 0x220   :  { %822 = vpow2.f32 %v492_v9  ;;  %v477_v12 = vsub.f32 %v429_v32, %v449_v10  ;;  %v474_v13 = vsub.f32 %v426_v33, %v443_v11 }
 0x222   :  { %v496_v14 = vmul.f32 1.442695, %v477_v12  ;;  %v490_v15 = vmul.f32 1.442695, %v474_v13 }
 0x223   :  { %v447_v16 = vpop.xlane.xlu1 %446 }
 0x224   :  { %824 = vpow2.f32 %v496_v14  ;;  %v476_v17 = vsub.f32 %v428_v38, %v447_v16 }
 0x225   :  { %826 = vpow2.f32 %v490_v15  ;;  %v451_v18 = vpop.xlane.xlu0 %450 }
 0x226   :  { %v494_v19 = vmul.f32 1.442695, %v476_v17  ;;  %v478_v21 = vsub.f32 %v1095_v40, %v451_v18 }
 0x227   :  { %v453_v22 = vpop.xlane.xlu1 %452 }
 0x228   :  { %828 = vpow2.f32 %v494_v19  ;;  %v479_v23 = vsub.f32 %v431_v44, %v453_v22  ;;  %v498_v25 = vmul.f32 1.442695, %v478_v21 }
 0x229   :  { %v455_v27 = vpop.xlane.xlu0 %454 }
 0x22a   :  { %v500_v28 = vmul.f32 1.442695, %v479_v23  ;;  %v480_v30 = vsub.f32 %v1108_v46, %v455_v27 }
 0x22b   :  { %v457_v32 = vpop.xlane.xlu1 %456 }
 0x22c   :  { %830 = vpow2.f32 %v500_v28  ;;  %v481_v33 = vsub.f32 %v433_v50, %v457_v32  ;;  %v502_v35 = vmul.f32 1.442695, %v480_v30 }
 0x22d   :  { %v1180_v34 = vpop.eup %822  ;;  %832 = vpow2.f32 %v498_v25  ;;  %v459_v38 = vpop.xlane.xlu0 %458 }
 0x22e   :  { %v504_v39 = vmul.f32 1.442695, %v481_v33  ;;  %v482_v41 = vsub.f32 %v1121_v52, %v459_v38  ;;  %524 = vadd.xlane.f32.xlu1 %v1180_v34 }
 0x22f   :  { %v461_v40 = vpop.xlane.xlu1 %460 }
 0x230   :  { %834 = vpow2.f32 %v504_v39  ;;  %v483_v44 = vsub.f32 %v1131_v56, %v461_v40  ;;  %v506_v46 = vmul.f32 1.442695, %v482_v41 }
 0x231   :  { %v1185_v45 = vpop.eup %824  ;;  %836 = vpow2.f32 %v502_v35  ;;  %v463_v47 = vpop.xlane.xlu0 %462 }
 0x232   :  { %v1187_v50 = vpop.eup %826  ;;  %v508_v51 = vmul.f32 1.442695, %v483_v44  ;;  %v484_v53 = vsub.f32 %v1137_v58, %v463_v47  ;;  %528 = vadd.xlane.f32.xlu1 %v1185_v45 }
 0x233   :  { %522 = vadd.xlane.f32.xlu0 %v1187_v50  ;;  %v465_v52 = vpop.xlane.xlu1 %464 }
 0x234   :  { %838 = vpow2.f32 %v508_v51  ;;  %v485_v57 = vsub.f32 %v1147_v62, %v465_v52  ;;  %v510_v56 = vmul.f32 1.442695, %v484_v53 }
 0x235   :  { %v1193_v59 = vpop.eup %828  ;;  %840 = vpow2.f32 %v506_v46  ;;  %v467_v63 = vpop.xlane.xlu0 %466 }
 0x236   :  { %v512_v1 = vmul.f32 1.442695, %v485_v57  ;;  %v486_v7 = vsub.f32 %v1153_v0, %v467_v63 }
 0x237   :  { %526 = vadd.xlane.f32.xlu0 %v1193_v59  ;;  %v469_v8 = vpop.xlane.xlu1 %468 }
 0x238   :  { %842 = vpow2.f32 %v512_v1  ;;  %v487_v58 = vsub.f32 %v1163_v4, %v469_v8  ;;  %v514_v10 = vmul.f32 1.442695, %v486_v7 }
 0x239   :  { %v1198_v9 = vpop.eup %830  ;;  %844 = vpow2.f32 %v510_v56  ;;  %v471_v11 = vpop.xlane.xlu0 %470 }
 0x23a   :  { %v1200_v62 = vpop.eup %832  ;;  %v516_v12 = vmul.f32 1.442695, %v487_v58  ;;  %v488_v13 = vsub.f32 %v1169_v5, %v471_v11  ;;  %532 = vadd.xlane.f32.xlu1 %v1198_v9 }
 0x23b   :  { %530 = vadd.xlane.f32.xlu0 %v1200_v62  ;;  %v473_v0 = vpop.xlane.xlu1 %472 }
 0x23c   :  { %846 = vpow2.f32 %v516_v12  ;;  %v489_v14 = vsub.f32 %v1175_v6, %v473_v0  ;;  %v518_v4 = vmul.f32 1.442695, %v488_v13 }
 0x23d   :  { %v1206_v15 = vpop.eup %834  ;;  %848 = vpow2.f32 %v514_v10 }
 0x23e   :  { %v1208_v16 = vpop.eup %836  ;;  %v520_v17 = vmul.f32 1.442695, %v489_v14  ;;  %536 = vadd.xlane.f32.xlu1 %v1206_v15 }
 0x23f   :  { %534 = vadd.xlane.f32.xlu0 %v1208_v16 }
 0x240   :  { %850 = vpow2.f32 %v520_v17 }
 0x241   :  { %v1212_v5 = vpop.eup %838  ;;  %852 = vpow2.f32 %v518_v4 }
 0x242   :  { %v1214_v18 = vpop.eup %840  ;;  %540 = vadd.xlane.f32.xlu1 %v1212_v5 }
 0x243   :  { %538 = vadd.xlane.f32.xlu0 %v1214_v18 }
 0x245   :  { %v1218_v6 = vpop.eup %842 }
 0x246   :  { %v1220_v19 = vpop.eup %844  ;;  %544 = vadd.xlane.f32.xlu1 %v1218_v6 }
 0x247   :  { %542 = vadd.xlane.f32.xlu0 %v1220_v19 }
 0x249   :  { %v1224_v21 = vpop.eup %846 }
 0x24a   :  { %v1226_v22 = vpop.eup %848  ;;  %548 = vadd.xlane.f32.xlu1 %v1224_v21 }
 0x24b   :  { %546 = vadd.xlane.f32.xlu0 %v1226_v22 }
 0x24d   :  { %v1230_v23 = vpop.eup %850 }
 0x24e   :  { %v1232_v25 = vpop.eup %852  ;;  %552 = vadd.xlane.f32.xlu1 %v1230_v23 }
 0x24f   :  { %550 = vadd.xlane.f32.xlu0 %v1232_v25 }
 0x2b7   :  { %v525_v27 = vpop.xlane.xlu1 %524 }
 0x2b8   :  { %854 = vrcp.f32 %v525_v27 }
 0x2bb   :  { %v529_v28 = vpop.xlane.xlu1 %528 }
 0x2bc   :  { %856 = vrcp.f32 %v529_v28  ;;  %v523_v30 = vpop.xlane.xlu0 %522 }
 0x2bd   :  { %858 = vrcp.f32 %v523_v30 }
 0x2c0   :  { %v527_v32 = vpop.xlane.xlu0 %526 }
 0x2c1   :  { %860 = vrcp.f32 %v527_v32 }
 0x2c3   :  { %v533_v33 = vpop.xlane.xlu1 %532 }
 0x2c4   :  { %862 = vrcp.f32 %v533_v33  ;;  %v531_v35 = vpop.xlane.xlu0 %530 }
 0x2c5   :  { %v855_v38 = vpop.eup %854  ;;  %864 = vrcp.f32 %v531_v35 }
 0x2c6   :  { %v557_v39 = vmul.f32 %v855_v38, %v1180_v34 }
 0x2c7   :  { %v537_v41 = vpop.xlane.xlu1 %536 }
 0x2c8   :  { %v588_v40 = vsel %vm586_vm4, %v1068_v24, %v557_v39  ;;  %866 = vrcp.f32 %v537_v41  ;;  %v535_v44 = vpop.xlane.xlu0 %534 }
 0x2c9   :  { %v857_v46 = vpop.eup %856  ;;  %604 = vst [vmem:[#allocation2 + $0x8] sm:$0xff] %v588_v40  ;;  %868 = vrcp.f32 %v535_v44 }
 0x2ca   :  { %v859_v47 = vpop.eup %858  ;;  %v561_v51 = vmul.f32 %v857_v46, %v1185_v45 }
 0x2cb   :  { %v555_v53 = vmul.f32 %v859_v47, %v1187_v50  ;;  %v541_v52 = vpop.xlane.xlu1 %540 }
 0x2cc   :  { %v590_v34 = vsel %vm586_vm4, %v1075_v29, %v561_v51  ;;  %870 = vrcp.f32 %v541_v52  ;;  %v539_v57 = vpop.xlane.xlu0 %538 }
 0x2cd   :  { %606 = vst [vmem:[#allocation2 + $0x18] sm:$0xff] %v590_v34  ;;  %v587_v24 = vsel %vm586_vm4, %v1070_v26, %v555_v53  ;;  %872 = vrcp.f32 %v539_v57 }
 0x2ce   :  { %v861_v56 = vpop.eup %860  ;;  %603 = vst [vmem:[#allocation2] sm:$0xff] %v587_v24 }
 0x2cf   :  { %v559_v63 = vmul.f32 %v861_v56, %v1193_v59  ;;  %v545_v45 = vpop.xlane.xlu1 %544 }
 0x2d0   :  { %874 = vrcp.f32 %v545_v45  ;;  %v543_v50 = vpop.xlane.xlu0 %542 }
 0x2d1   :  { %v863_v1 = vpop.eup %862  ;;  %v589_v29 = vsel %vm586_vm4, %v1077_v31, %v559_v63  ;;  %876 = vrcp.f32 %v543_v50 }
 0x2d2   :  { %v865_v7 = vpop.eup %864  ;;  %605 = vst [vmem:[#allocation2 + $0x10] sm:$0xff] %v589_v29  ;;  %v565_v8 = vmul.f32 %v863_v1, %v1198_v9 }
 0x2d3   :  { %v563_v26 = vmul.f32 %v865_v7, %v1200_v62  ;;  %v549_v58 = vpop.xlane.xlu1 %548 }
 0x2d4   :  { %v592_v59 = vsel %vm586_vm4, %v1085_v36, %v565_v8  ;;  %878 = vrcp.f32 %v549_v58  ;;  %v547_v10 = vpop.xlane.xlu0 %546 }
 0x2d5   :  { %v867_v11 = vpop.eup %866  ;;  %608 = vst [vmem:[#allocation2 + $0x28] sm:$0xff] %v592_v59  ;;  %v591_v31 = vsel %vm586_vm4, %v1087_v37, %v563_v26  ;;  %880 = vrcp.f32 %v547_v10 }
 0x2d6   :  { %v869_v12 = vpop.eup %868  ;;  %607 = vst [vmem:[#allocation2 + $0x20] sm:$0xff] %v591_v31  ;;  %v569_v9 = vmul.f32 %v867_v11, %v1206_v15 }
 0x2d7   :  { %v567_v62 = vmul.f32 %v869_v12, %v1208_v16  ;;  %v553_v13 = vpop.xlane.xlu1 %552 }
 0x2d8   :  { %v594_v36 = vsel %vm586_vm4, %v1098_v42, %v569_v9  ;;  %882 = vrcp.f32 %v553_v13  ;;  %v551_v0 = vpop.xlane.xlu0 %550 }
 0x2d9   :  { %v871_v14 = vpop.eup %870  ;;  %610 = vst [vmem:[#allocation2 + $0x38] sm:$0xff] %v594_v36  ;;  %v593_v37 = vsel %vm586_vm4, %v1100_v43, %v567_v62  ;;  %884 = vrcp.f32 %v551_v0 }
 0x2da   :  { %v873_v4 = vpop.eup %872  ;;  %609 = vst [vmem:[#allocation2 + $0x30] sm:$0xff] %v593_v37  ;;  %v573_v15 = vmul.f32 %v871_v14, %v1212_v5 }
 0x2db   :  { %v571_v16 = vmul.f32 %v873_v4, %v1214_v18 }
 0x2dc   :  { %v596_v17 = vsel %vm586_vm4, %v1111_v48, %v573_v15 }
 0x2dd   :  { %v875_v42 = vpop.eup %874  ;;  %612 = vst [vmem:[#allocation2 + $0x48] sm:$0xff] %v596_v17  ;;  %v595_v27 = vsel %vm586_vm4, %v1113_v49, %v571_v16 }
 0x2de   :  { %v877_v28 = vpop.eup %876  ;;  %611 = vst [vmem:[#allocation2 + $0x40] sm:$0xff] %v595_v27  ;;  %v577_v43 = vmul.f32 %v875_v42, %v1218_v6 }
 0x2df   :  { %v575_v30 = vmul.f32 %v877_v28, %v1220_v19 }
 0x2e0   :  { %v598_v5 = vsel %vm586_vm4, %v1124_v54, %v577_v43 }
 0x2e1   :  { %v879_v18 = vpop.eup %878  ;;  %614 = vst [vmem:[#allocation2 + $0x58] sm:$0xff] %v598_v5  ;;  %v597_v48 = vsel %vm586_vm4, %v1126_v55, %v575_v30 }
 0x2e2   :  { %v881_v32 = vpop.eup %880  ;;  %613 = vst [vmem:[#allocation2 + $0x50] sm:$0xff] %v597_v48  ;;  %v581_v49 = vmul.f32 %v879_v18, %v1224_v21 }
 0x2e3   :  { %v579_v33 = vmul.f32 %v881_v32, %v1226_v22 }
 0x2e4   :  { %v600_v6 = vsel %vm586_vm4, %v1140_v60, %v581_v49 }
 0x2e5   :  { %v883_v19 = vpop.eup %882  ;;  %616 = vst [vmem:[#allocation2 + $0x68] sm:$0xff] %v600_v6  ;;  %v599_v54 = vsel %vm586_vm4, %v1142_v61, %v579_v33 }
 0x2e6   :  { %v885_v35 = vpop.eup %884  ;;  %615 = vst [vmem:[#allocation2 + $0x60] sm:$0xff] %v599_v54  ;;  %v585_v55 = vmul.f32 %v883_v19, %v1230_v23 }
 0x2e7   :  { %v583_v21 = vmul.f32 %v885_v35, %v1232_v25 }
 0x2e8   :  { %v602_v22 = vsel %vm586_vm4, %v1156_v2, %v585_v55 }
 0x2e9   :  { %618 = vst [vmem:[#allocation2 + $0x78] sm:$0xff] %v602_v22  ;;  %v601_v60 = vsel %vm586_vm4, %v1158_v3, %v583_v21 }
 0x2ea   :  { %617 = vst [vmem:[#allocation2 + $0x70] sm:$0xff] %v601_v60 }
 0x2eb   :  { %897 = shalt.err (!%p894_p4)
}
 0x2ec   :  { %s909_s6 = smov 128   ;;  %s910_s7 = smov 8  }
 0x2ed   :  { %630 = dma.vmem_to_hbm [thread:$0]  %s625_s30, 2048, %s1308_s4, [#allocation3], %s909_s6, %s909_s6, %s910_s7  }
 0x2ee   :  { %906 = dma.done.wait [#allocation3], 2048  }
 0x2ef   :  { %907 = vsyncadd [#allocation3], 4294965248 }
 0x2f0   :  { %634 = vsyncpa [#allocation3], 1 }

</bundles_post_ra>
